<compile_context>
chip_gen: v6e
topology: v6e:2x2x1
jax: 0.10.0
libtpu: 0.0.40
codegen_flags: <defaults>
</compile_context>

<pallas_src>
import functools

import jax
import jax.numpy as jnp
from jax.experimental import pallas as pl
from jax.experimental.pallas import tpu as pltpu


def _residual_add_kernel(x_ref, w_ref, b_ref, o_ref):
    # x_ref: (TM, Hp)   w_ref: (Hp, Hp)   b_ref: (1, Hp) f32   o_ref: (TM, Hp)
    x = x_ref[...]
    # fn(x): dense projection on the MXU, accumulate in f32.
    y = jnp.dot(x, w_ref[...], preferred_element_type=jnp.float32)
    y = y + b_ref[...]
    # residual add (the ResidualAdd module's own compute), fused in-kernel.
    o_ref[...] = (y + x.astype(jnp.float32)).astype(o_ref.dtype)


def _round_up(n, m):
    return ((n + m - 1) // m) * m


@functools.partial(jax.jit, static_argnames=("tm",))
def residual_add(x, w, b, *, tm=256):
    """x: (B, S, H), w: (H, H), b: (H,).  Returns fn(x) + x with fn = Linear."""
    B, S, H = x.shape
    M = B * S

    # Lane-dense hidden dim and MXU/row-tile-aligned M (no remainder tile).
    Hp = _round_up(H, 128)
    TM = tm
    Mp = _round_up(M, TM)

    x2d = x.reshape(M, H)
    if Hp != H or Mp != M:
        x2d = jnp.pad(x2d, ((0, Mp - M), (0, Hp - H)))
    wp = jnp.pad(w, ((0, Hp - H), (0, Hp - H))) if Hp != H else w
    # Pre-cast bias to the accumulate dtype once, in the wrapper.
    b2d = jnp.pad(b, (0, Hp - H)).astype(jnp.float32).reshape(1, Hp)

    grid = (Mp // TM,)

    out = pl.pallas_call(
        _residual_add_kernel,
        out_shape=jax.ShapeDtypeStruct((Mp, Hp), x.dtype),
        grid_spec=pltpu.PrefetchScalarGridSpec(
            num_scalar_prefetch=0,
            grid=grid,
            in_specs=[
                # Streaming activations: one row tile per grid step.
                pl.BlockSpec((TM, Hp), lambda i: (i, 0)),
                # Weight / bias: constant block index -> VMEM-resident.
                pl.BlockSpec((Hp, Hp), lambda i: (0, 0)),
                pl.BlockSpec((1, Hp), lambda i: (0, 0)),
            ],
            out_specs=pl.BlockSpec((TM, Hp), lambda i: (i, 0)),
        ),
        compiler_params=pltpu.CompilerParams(
            # Row tiles are independent (no accumulator across the grid axis):
            # lets v7x shard them across its two TensorCores; harmless on
            # v5e/v6e.
            dimension_semantics=("parallel",),
        ),
    )(x2d, wp, b2d)

    return out[:M, :H].reshape(B, S, H)


if __name__ == "__main__":
    B, S, H = 2, 8, 32  # small ViT-ish token shapes
    key = jax.random.PRNGKey(0)
    kx, kw, kb = jax.random.split(key, 3)

    x = jax.random.normal(kx, (B, S, H), dtype=jnp.float32)
    # Deterministic "Linear(H, H)" parameters (synthetic init, no checkpoint).
    w = jax.random.normal(kw, (H, H), dtype=jnp.float32) * (1.0 / jnp.sqrt(H))
    b = jax.random.normal(kb, (H,), dtype=jnp.float32) * 0.01

    out = jax.block_until_ready(residual_add(x, w, b))

    # reference check: fn(x) + x
    ref = jnp.einsum("bsh,hk->bsk", x, w) + b + x
    assert out.shape == (B, S, H)
    assert jnp.allclose(out, ref, atol=1e-4, rtol=1e-4)
    print("KERNEL_OK")
</pallas_src>

<mosaic_0001>
module attributes {stable_mosaic.version = 11 : i64} {
  func.func @_residual_add_kernel(%arg0: i32, %arg1: memref<256x128xf32, #tpu.memory_space<vmem>>, %arg2: memref<128x128xf32, #tpu.memory_space<vmem>>, %arg3: memref<1x128xf32, #tpu.memory_space<vmem>>, %arg4: memref<256x128xf32, #tpu.memory_space<vmem>>) attributes {dimension_semantics = [#tpu.dimension_semantics<parallel>], iteration_bounds = array<i64: 1>, scalar_prefetch = 0 : i64, scratch_operands = 0 : i64, tpu.core_type = #tpu.core_type<tc>, window_params = [{transform_indices = @transform_0, window_bounds = array<i64: 256, 128>}, {pipeline_mode = #tpu.pipeline_mode<synchronous>, transform_indices = @transform_1, window_bounds = array<i64: 128, 128>}, {pipeline_mode = #tpu.pipeline_mode<synchronous>, transform_indices = @transform_2, window_bounds = array<i64: 1, 128>}, {transform_indices = @transform_3, window_bounds = array<i64: 256, 128>}]} {
    %c0 = arith.constant 0 : index
    %c0_0 = arith.constant 0 : index
    %0 = vector.load %arg1[%c0, %c0_0] : memref<256x128xf32, #tpu.memory_space<vmem>>, vector<256x128xf32>
    %c0_1 = arith.constant 0 : index
    %c0_2 = arith.constant 0 : index
    %1 = vector.load %arg2[%c0_1, %c0_2] : memref<128x128xf32, #tpu.memory_space<vmem>>, vector<128x128xf32>
    %cst = arith.constant dense<0.000000e+00> : vector<256x128xf32>
    %2 = tpu.matmul %0, %1, %cst {dimension_numbers = #tpu.dot_dimension_numbers<[1], [0], [0], [1], [0, 0, 1, 1], [], []>} : vector<256x128xf32>, vector<128x128xf32>, vector<256x128xf32> -> vector<256x128xf32>
    %c0_3 = arith.constant 0 : index
    %c0_4 = arith.constant 0 : index
    %3 = vector.load %arg3[%c0_3, %c0_4] : memref<1x128xf32, #tpu.memory_space<vmem>>, vector<1x128xf32>
    %4 = vector.broadcast %3 : vector<1x128xf32> to vector<256x128xf32>
    %5 = arith.addf %2, %4 : vector<256x128xf32>
    %6 = arith.addf %5, %0 : vector<256x128xf32>
    %c0_5 = arith.constant 0 : index
    %c0_6 = arith.constant 0 : index
    %7 = vector.load %arg4[%c0_5, %c0_6] : memref<256x128xf32, #tpu.memory_space<vmem>>, vector<256x128xf32>
    tpu.vector_store %arg4[%c0_5, %c0_6], %6 {strides = array<i32>} : memref<256x128xf32, #tpu.memory_space<vmem>>, vector<256x128xf32>,
    return
  }
  func.func @transform_0(%arg0: i32) -> (i32, i32) {
    %c0_i32 = arith.constant 0 : i32
    %c0_i32_0 = arith.constant 0 : i32
    return %arg0, %c0_i32 : i32, i32
  }
  func.func @transform_1(%arg0: i32) -> (i32, i32) {
    %c0_i32 = arith.constant 0 : i32
    %c0_i32_0 = arith.constant 0 : i32
    %c0_i32_1 = arith.constant 0 : i32
    return %c0_i32, %c0_i32_0 : i32, i32
  }
  func.func @transform_2(%arg0: i32) -> (i32, i32) {
    %c0_i32 = arith.constant 0 : i32
    %c0_i32_0 = arith.constant 0 : i32
    %c0_i32_1 = arith.constant 0 : i32
    return %c0_i32, %c0_i32_0 : i32, i32
  }
  func.func @transform_3(%arg0: i32) -> (i32, i32) {
    %c0_i32 = arith.constant 0 : i32
    %c0_i32_0 = arith.constant 0 : i32
    return %arg0, %c0_i32 : i32, i32
  }
}

</mosaic_0001>

<bundles_post_ra>
// kernel: residual_add.1
= control target key start
LH: loop header
LB: loop body
LE: loop exit
PB: predicated region body
PF: predicated region fallthrough
CT: control target
= control target key end

     0   :  { %s948_s1 = inlined_call_operand.vmem [shape: f32[128,128], index: 1, kind: input, shape index: {}]   ;;  %s949_s0 = inlined_call_operand.vmem [shape: f32[256,128], index: 0, kind: input, shape index: {}]   ;;  %s950_s2 = inlined_call_operand.vmem [shape: f32[1,128], index: 2, kind: input, shape index: {}]   ;;  %s951_s3 = inlined_call_operand.vmem [shape: f32[256,128], index: 3, kind: output, shape index: {}]  }
   0x1   :  { %v61_v0 = vld [vmem:[%s948_s1 + $0x78] sm:$0xff]  ;;  %v60_v1 = vld [vmem:[%s948_s1 + $0x70] sm:$0xff]  ;;  %v59_v2 = vld [vmem:[%s948_s1 + $0x68] sm:$0xff] }
   0x2   :  { %411 = vmatprep.subr.mxu0 %v61_v0  ;;  %491 = vmatprep.subr.mxu1 %v61_v0  ;;  %v58_v3 = vld [vmem:[%s948_s1 + $0x60] sm:$0xff]  ;;  %v57_v4 = vld [vmem:[%s948_s1 + $0x58] sm:$0xff]  ;;  %v56_v5 = vld [vmem:[%s948_s1 + $0x50] sm:$0xff] }
   0x3   :  { %412 = vmatpush3.msra.mxu0 %v61_v0  ;;  %507 = vmatpush3.msra.mxu1 %v61_v0  ;;  %v55_v6 = vld [vmem:[%s948_s1 + $0x48] sm:$0xff]  ;;  %v54_v7 = vld [vmem:[%s948_s1 + $0x40] sm:$0xff]  ;;  %v53_v8 = vld [vmem:[%s948_s1 + $0x38] sm:$0xff] }
   0x4   :  { %413 = vmatprep.subr.mxu0 %v60_v1  ;;  %492 = vmatprep.subr.mxu1 %v60_v1  ;;  %v52_v9 = vld [vmem:[%s948_s1 + $0x30] sm:$0xff]  ;;  %v51_v10 = vld [vmem:[%s948_s1 + $0x28] sm:$0xff]  ;;  %v50_v11 = vld [vmem:[%s948_s1 + $0x20] sm:$0xff] }
   0x5   :  { %414 = vmatpush3.msra.mxu0 %v60_v1  ;;  %508 = vmatpush3.msra.mxu1 %v60_v1  ;;  %v49_v12 = vld [vmem:[%s948_s1 + $0x18] sm:$0xff]  ;;  %v48_v13 = vld [vmem:[%s948_s1 + $0x10] sm:$0xff]  ;;  %v47_v14 = vld [vmem:[%s948_s1 + $0x8] sm:$0xff] }
   0x6   :  { %415 = vmatprep.subr.mxu0 %v59_v2  ;;  %493 = vmatprep.subr.mxu1 %v59_v2  ;;  %v46_v15 = vld [vmem:[%s948_s1] sm:$0xff]  ;;  %v604_v18 = vld [vmem:[%s949_s0 + $0x8] sm:$0xff]  ;;  %v614_v20 = vld [vmem:[%s949_s0 + $0x10] sm:$0xff] }
   0x7   :  { %416 = vmatpush3.msra.mxu0 %v59_v2  ;;  %509 = vmatpush3.msra.mxu1 %v59_v2  ;;  %v594_v16 = vld [vmem:[%s949_s0] sm:$0xff]  ;;  %v609_v19 = vld [vmem:[%s949_s0 + $0x88] sm:$0xff]  ;;  %v619_v21 = vld [vmem:[%s949_s0 + $0x90] sm:$0xff] }
   0x8   :  { %417 = vmatprep.subr.mxu0 %v58_v3  ;;  %494 = vmatprep.subr.mxu1 %v58_v3  ;;  %v599_v17 = vld [vmem:[%s949_s0 + $0x80] sm:$0xff]  ;;  %v630_v22 = vld [vmem:[%s949_s0 + $0x18] sm:$0xff]  ;;  %v654_v26 = vld [vmem:[%s949_s0 + $0x28] sm:$0xff] }
   0x9   :  { %418 = vmatpush3.msra.mxu0 %v58_v3  ;;  %510 = vmatpush3.msra.mxu1 %v58_v3  ;;  %v635_v23 = vld [vmem:[%s949_s0 + $0x98] sm:$0xff]  ;;  %v640_v24 = vld [vmem:[%s949_s0 + $0x20] sm:$0xff]  ;;  %v659_v27 = vld [vmem:[%s949_s0 + $0xa8] sm:$0xff] }
   0xa   :  { %419 = vmatprep.subr.mxu0 %v57_v4  ;;  %495 = vmatprep.subr.mxu1 %v57_v4  ;;  %v645_v25 = vld [vmem:[%s949_s0 + $0xa0] sm:$0xff]  ;;  %v664_v28 = vld [vmem:[%s949_s0 + $0x30] sm:$0xff]  ;;  %v678_v30 = vld [vmem:[%s949_s0 + $0x38] sm:$0xff] }
   0xb   :  { %420 = vmatpush3.msra.mxu0 %v57_v4  ;;  %511 = vmatpush3.msra.mxu1 %v57_v4  ;;  %v669_v29 = vld [vmem:[%s949_s0 + $0xb0] sm:$0xff]  ;;  %v683_v31 = vld [vmem:[%s949_s0 + $0xb8] sm:$0xff]  ;;  %v688_v32 = vld [vmem:[%s949_s0 + $0x40] sm:$0xff] }
   0xc   :  { %421 = vmatprep.subr.mxu0 %v56_v5  ;;  %496 = vmatprep.subr.mxu1 %v56_v5  ;;  %v693_v33 = vld [vmem:[%s949_s0 + $0xc0] sm:$0xff]  ;;  %v702_v34 = vld [vmem:[%s949_s0 + $0x48] sm:$0xff]  ;;  %v712_v36 = vld [vmem:[%s949_s0 + $0x50] sm:$0xff] }
   0xd   :  { %422 = vmatpush3.msra.mxu0 %v56_v5  ;;  %512 = vmatpush3.msra.mxu1 %v56_v5  ;;  %v707_v35 = vld [vmem:[%s949_s0 + $0xc8] sm:$0xff]  ;;  %v717_v37 = vld [vmem:[%s949_s0 + $0xd0] sm:$0xff]  ;;  %v726_v38 = vld [vmem:[%s949_s0 + $0x58] sm:$0xff] }
   0xe   :  { %423 = vmatprep.subr.mxu0 %v55_v6  ;;  %497 = vmatprep.subr.mxu1 %v55_v6  ;;  %v731_v39 = vld [vmem:[%s949_s0 + $0xd8] sm:$0xff]  ;;  %v736_v40 = vld [vmem:[%s949_s0 + $0x60] sm:$0xff]  ;;  %v750_v42 = vld [vmem:[%s949_s0 + $0x68] sm:$0xff] }
   0xf   :  { %424 = vmatpush3.msra.mxu0 %v55_v6  ;;  %513 = vmatpush3.msra.mxu1 %v55_v6  ;;  %v741_v41 = vld [vmem:[%s949_s0 + $0xe0] sm:$0xff]  ;;  %v755_v43 = vld [vmem:[%s949_s0 + $0xe8] sm:$0xff]  ;;  %v760_v44 = vld [vmem:[%s949_s0 + $0x70] sm:$0xff] }
  0x10   :  { %425 = vmatprep.subr.mxu0 %v54_v7  ;;  %498 = vmatprep.subr.mxu1 %v54_v7  ;;  %v765_v45 = vld [vmem:[%s949_s0 + $0xf0] sm:$0xff]  ;;  %v774_v46 = vld [vmem:[%s949_s0 + $0x78] sm:$0xff]  ;;  %v786_v48 = vld [vmem:[%s950_s2] ss:$0 sm:$0xff] }
  0x11   :  { %426 = vmatpush3.msra.mxu0 %v54_v7  ;;  %514 = vmatpush3.msra.mxu1 %v54_v7  ;;  %v779_v47 = vld [vmem:[%s949_s0 + $0xf8] sm:$0xff] }
  0x12   :  { %427 = vmatprep.subr.mxu0 %v53_v8  ;;  %499 = vmatprep.subr.mxu1 %v53_v8 }
  0x13   :  { %428 = vmatpush3.msra.mxu0 %v53_v8  ;;  %515 = vmatpush3.msra.mxu1 %v53_v8 }
  0x14   :  { %429 = vmatprep.subr.mxu0 %v52_v9  ;;  %500 = vmatprep.subr.mxu1 %v52_v9 }
  0x15   :  { %430 = vmatpush3.msra.mxu0 %v52_v9  ;;  %516 = vmatpush3.msra.mxu1 %v52_v9 }
  0x16   :  { %431 = vmatprep.subr.mxu0 %v51_v10  ;;  %501 = vmatprep.subr.mxu1 %v51_v10 }
  0x17   :  { %432 = vmatpush3.msra.mxu0 %v51_v10  ;;  %517 = vmatpush3.msra.mxu1 %v51_v10 }
  0x18   :  { %433 = vmatprep.subr.mxu0 %v50_v11  ;;  %502 = vmatprep.subr.mxu1 %v50_v11 }
  0x19   :  { %434 = vmatpush3.msra.mxu0 %v50_v11  ;;  %518 = vmatpush3.msra.mxu1 %v50_v11 }
  0x1a   :  { %435 = vmatprep.subr.mxu0 %v49_v12  ;;  %503 = vmatprep.subr.mxu1 %v49_v12 }
  0x1b   :  { %436 = vmatpush3.msra.mxu0 %v49_v12  ;;  %519 = vmatpush3.msra.mxu1 %v49_v12 }
  0x1c   :  { %437 = vmatprep.subr.mxu0 %v48_v13  ;;  %504 = vmatprep.subr.mxu1 %v48_v13 }
  0x1d   :  { %438 = vmatpush3.msra.mxu0 %v48_v13  ;;  %520 = vmatpush3.msra.mxu1 %v48_v13 }
  0x1e   :  { %439 = vmatprep.subr.mxu0 %v47_v14  ;;  %505 = vmatprep.subr.mxu1 %v47_v14 }
  0x1f   :  { %440 = vmatpush3.msra.mxu0 %v47_v14  ;;  %521 = vmatpush3.msra.mxu1 %v47_v14 }
  0x20   :  { %441 = vmatprep.subr.mxu0 %v46_v15  ;;  %506 = vmatprep.subr.mxu1 %v46_v15 }
  0x21   :  { %442 = vmatpush3.msra.mxu0 %v46_v15  ;;  %522 = vmatpush3.msra.mxu1 %v46_v15 }
  0x22   :  { %443 = vmatprep.mubr.f32.mxu0 %v594_v16  ;;  %467 = vmatprep.mubr.f32.mxu1 %v599_v17 }
  0x23   :  { %444 = vmatmul.mubr.f32.vlgmr.msra.gmra.mxu0 %v604_v18  ;;  %468 = vmatmul.mubr.f32.vlgmr.msra.gmra.mxu1 %v609_v19 }
  0x24   :  { %446 = vmatprep.mubr.f32.mxu0 %v614_v20  ;;  %470 = vmatprep.mubr.f32.mxu1 %v619_v21 }
  0x27   :  { %447 = vmatmul.mubr.f32.gmra.mxu0 %v630_v22  ;;  %471 = vmatmul.mubr.f32.gmra.mxu1 %v635_v23 }
  0x28   :  { %449 = vmatprep.mubr.f32.mxu0 %v640_v24  ;;  %473 = vmatprep.mubr.f32.mxu1 %v645_v25 }
  0x2b   :  { %450 = vmatmul.mubr.f32.gmra.mxu0 %v654_v26  ;;  %474 = vmatmul.mubr.f32.gmra.mxu1 %v659_v27 }
  0x2c   :  { %452 = vmatprep.mubr.f32.mxu0 %v664_v28  ;;  %476 = vmatprep.mubr.f32.mxu1 %v669_v29 }
  0x2f   :  { %453 = vmatmul.mubr.f32.gmra.mxu0 %v678_v30  ;;  %477 = vmatmul.mubr.f32.gmra.mxu1 %v683_v31 }
  0x30   :  { %455 = vmatprep.mubr.f32.mxu0 %v688_v32  ;;  %479 = vmatprep.mubr.f32.mxu1 %v693_v33 }
  0x33   :  { %456 = vmatmul.mubr.f32.gmra.mxu0 %v702_v34  ;;  %480 = vmatmul.mubr.f32.gmra.mxu1 %v707_v35 }
  0x34   :  { %458 = vmatprep.mubr.f32.mxu0 %v712_v36  ;;  %482 = vmatprep.mubr.f32.mxu1 %v717_v37 }
  0x37   :  { %459 = vmatmul.mubr.f32.gmra.mxu0 %v726_v38  ;;  %483 = vmatmul.mubr.f32.gmra.mxu1 %v731_v39 }
  0x38   :  { %461 = vmatprep.mubr.f32.mxu0 %v736_v40  ;;  %485 = vmatprep.mubr.f32.mxu1 %v741_v41 }
  0x3b   :  { %462 = vmatmul.mubr.f32.gmra.mxu0 %v750_v42  ;;  %486 = vmatmul.mubr.f32.gmra.mxu1 %v755_v43 }
  0x3c   :  { %464 = vmatprep.mubr.f32.mxu0 %v760_v44  ;;  %488 = vmatprep.mubr.f32.mxu1 %v765_v45 }
  0x3f   :  { %465 = vmatmul.mubr.f32.gmra.mxu0 %v774_v46  ;;  %489 = vmatmul.mubr.f32.gmra.mxu1 %v779_v47 }
  0xe3   :  { %v445_v49 = vpop.f32.mrf.mxu0  ;;  %v469_v50 = vpop.f32.mrf.mxu1 }
  0xe4   :  { %v141_v51 = vadd.f32 %v445_v49, %v786_v48  ;;  %v221_v52 = vadd.f32 %v469_v50, %v786_v48 }
  0xe5   :  { %v135_v53 = vpop.f32.mrf.mxu0  ;;  %v215_v54 = vpop.f32.mrf.mxu1 }
  0xe6   :  { %v295_v55 = vadd.f32 %v141_v51, %v604_v18  ;;  %v311_v56 = vadd.f32 %v221_v52, %v609_v19  ;;  %v136_v57 = vadd.f32 %v786_v48, %v135_v53  ;;  %v216_v58 = vadd.f32 %v786_v48, %v215_v54 }
  0xe7   :  { %v448_v59 = vpop.f32.mrf.mxu0  ;;  %v472_v60 = vpop.f32.mrf.mxu1 }
  0xe8   :  { %327 = vst [vmem:[%s951_s3 + $0x8] sm:$0xff] %v295_v55  ;;  %343 = vst [vmem:[%s951_s3 + $0x88] sm:$0xff] %v311_v56  ;;  %v294_v61 = vadd.f32 %v136_v57, %v594_v16  ;;  %v310_v62 = vadd.f32 %v216_v58, %v599_v17  ;;  %v151_v63 = vadd.f32 %v448_v59, %v786_v48 }
  0xe9   :  { %v231_v0 = vadd.f32 %v472_v60, %v786_v48  ;;  %v145_v1 = vpop.f32.mrf.mxu0  ;;  %v225_v2 = vpop.f32.mrf.mxu1 }
  0xea   :  { %326 = vst [vmem:[%s951_s3] sm:$0xff] %v294_v61  ;;  %342 = vst [vmem:[%s951_s3 + $0x80] sm:$0xff] %v310_v62  ;;  %v297_v3 = vadd.f32 %v151_v63, %v630_v22  ;;  %v146_v5 = vadd.f32 %v786_v48, %v145_v1  ;;  %v226_v6 = vadd.f32 %v786_v48, %v225_v2 }
  0xeb   :  { %v313_v4 = vadd.f32 %v231_v0, %v635_v23  ;;  %v451_v7 = vpop.f32.mrf.mxu0  ;;  %v475_v8 = vpop.f32.mrf.mxu1 }
  0xec   :  { %329 = vst [vmem:[%s951_s3 + $0x18] sm:$0xff] %v297_v3  ;;  %v296_v9 = vadd.f32 %v146_v5, %v614_v20  ;;  %v312_v10 = vadd.f32 %v226_v6, %v619_v21  ;;  %v161_v11 = vadd.f32 %v451_v7, %v786_v48  ;;  %v241_v12 = vadd.f32 %v475_v8, %v786_v48 }
  0xed   :  { %345 = vst [vmem:[%s951_s3 + $0x98] sm:$0xff] %v313_v4  ;;  %v155_v13 = vpop.f32.mrf.mxu0  ;;  %v235_v14 = vpop.f32.mrf.mxu1 }
  0xee   :  { %328 = vst [vmem:[%s951_s3 + $0x10] sm:$0xff] %v296_v9  ;;  %344 = vst [vmem:[%s951_s3 + $0x90] sm:$0xff] %v312_v10  ;;  %v299_v15 = vadd.f32 %v161_v11, %v654_v26  ;;  %v315_v16 = vadd.f32 %v241_v12, %v659_v27  ;;  %v156_v17 = vadd.f32 %v786_v48, %v155_v13 }
  0xef   :  { %v236_v18 = vadd.f32 %v786_v48, %v235_v14  ;;  %v454_v19 = vpop.f32.mrf.mxu0  ;;  %v478_v20 = vpop.f32.mrf.mxu1 }
  0xf0   :  { %331 = vst [vmem:[%s951_s3 + $0x28] sm:$0xff] %v299_v15  ;;  %347 = vst [vmem:[%s951_s3 + $0xa8] sm:$0xff] %v315_v16  ;;  %v298_v21 = vadd.f32 %v156_v17, %v640_v24  ;;  %v171_v23 = vadd.f32 %v454_v19, %v786_v48  ;;  %v251_v26 = vadd.f32 %v478_v20, %v786_v48 }
  0xf1   :  { %v314_v22 = vadd.f32 %v236_v18, %v645_v25  ;;  %v165_v27 = vpop.f32.mrf.mxu0  ;;  %v245_v49 = vpop.f32.mrf.mxu1 }
  0xf2   :  { %330 = vst [vmem:[%s951_s3 + $0x20] sm:$0xff] %v298_v21  ;;  %v301_v50 = vadd.f32 %v171_v23, %v678_v30  ;;  %v317_v24 = vadd.f32 %v251_v26, %v683_v31  ;;  %v166_v25 = vadd.f32 %v786_v48, %v165_v27  ;;  %v246_v51 = vadd.f32 %v786_v48, %v245_v49 }
  0xf3   :  { %346 = vst [vmem:[%s951_s3 + $0xa0] sm:$0xff] %v314_v22  ;;  %v457_v52 = vpop.f32.mrf.mxu0  ;;  %v481_v53 = vpop.f32.mrf.mxu1 }
  0xf4   :  { %333 = vst [vmem:[%s951_s3 + $0x38] sm:$0xff] %v301_v50  ;;  %349 = vst [vmem:[%s951_s3 + $0xb8] sm:$0xff] %v317_v24  ;;  %v300_v54 = vadd.f32 %v166_v25, %v664_v28  ;;  %v316_v30 = vadd.f32 %v246_v51, %v669_v29  ;;  %v181_v31 = vadd.f32 %v457_v52, %v786_v48 }
  0xf5   :  { %v261_v55 = vadd.f32 %v481_v53, %v786_v48  ;;  %v175_v56 = vpop.f32.mrf.mxu0  ;;  %v255_v57 = vpop.f32.mrf.mxu1 }
  0xf6   :  { %332 = vst [vmem:[%s951_s3 + $0x30] sm:$0xff] %v300_v54  ;;  %348 = vst [vmem:[%s951_s3 + $0xb0] sm:$0xff] %v316_v30  ;;  %v303_v58 = vadd.f32 %v181_v31, %v702_v34  ;;  %v176_v29 = vadd.f32 %v786_v48, %v175_v56  ;;  %v256_v59 = vadd.f32 %v786_v48, %v255_v57 }
  0xf7   :  { %v319_v28 = vadd.f32 %v261_v55, %v707_v35  ;;  %v460_v60 = vpop.f32.mrf.mxu0  ;;  %v484_v61 = vpop.f32.mrf.mxu1 }
  0xf8   :  { %335 = vst [vmem:[%s951_s3 + $0x48] sm:$0xff] %v303_v58  ;;  %v302_v62 = vadd.f32 %v176_v29, %v688_v32  ;;  %v318_v34 = vadd.f32 %v256_v59, %v693_v33  ;;  %v191_v35 = vadd.f32 %v460_v60, %v786_v48  ;;  %v271_v63 = vadd.f32 %v484_v61, %v786_v48 }
  0xf9   :  { %351 = vst [vmem:[%s951_s3 + $0xc8] sm:$0xff] %v319_v28  ;;  %v185_v0 = vpop.f32.mrf.mxu0  ;;  %v265_v1 = vpop.f32.mrf.mxu1 }
  0xfa   :  { %334 = vst [vmem:[%s951_s3 + $0x40] sm:$0xff] %v302_v62  ;;  %350 = vst [vmem:[%s951_s3 + $0xc0] sm:$0xff] %v318_v34  ;;  %v305_v2 = vadd.f32 %v191_v35, %v726_v38  ;;  %v321_v32 = vadd.f32 %v271_v63, %v731_v39  ;;  %v186_v33 = vadd.f32 %v786_v48, %v185_v0 }
  0xfb   :  { %v266_v3 = vadd.f32 %v786_v48, %v265_v1  ;;  %v463_v4 = vpop.f32.mrf.mxu0  ;;  %v487_v5 = vpop.f32.mrf.mxu1 }
  0xfc   :  { %337 = vst [vmem:[%s951_s3 + $0x58] sm:$0xff] %v305_v2  ;;  %353 = vst [vmem:[%s951_s3 + $0xd8] sm:$0xff] %v321_v32  ;;  %v304_v6 = vadd.f32 %v186_v33, %v712_v36  ;;  %v201_v39 = vadd.f32 %v463_v4, %v786_v48  ;;  %v281_v7 = vadd.f32 %v487_v5, %v786_v48 }
  0xfd   :  { %v320_v38 = vadd.f32 %v266_v3, %v717_v37  ;;  %v195_v8 = vpop.f32.mrf.mxu0  ;;  %v275_v9 = vpop.f32.mrf.mxu1 }
  0xfe   :  { %336 = vst [vmem:[%s951_s3 + $0x50] sm:$0xff] %v304_v6  ;;  %v307_v10 = vadd.f32 %v201_v39, %v750_v42  ;;  %v323_v36 = vadd.f32 %v281_v7, %v755_v43  ;;  %v196_v37 = vadd.f32 %v786_v48, %v195_v8  ;;  %v276_v11 = vadd.f32 %v786_v48, %v275_v9 }
  0xff   :  { %352 = vst [vmem:[%s951_s3 + $0xd0] sm:$0xff] %v320_v38  ;;  %v466_v12 = vpop.f32.mrf.mxu0  ;;  %v490_v13 = vpop.f32.mrf.mxu1 }
 0x100   :  { %339 = vst [vmem:[%s951_s3 + $0x68] sm:$0xff] %v307_v10  ;;  %355 = vst [vmem:[%s951_s3 + $0xe8] sm:$0xff] %v323_v36  ;;  %v306_v14 = vadd.f32 %v196_v37, %v736_v40  ;;  %v322_v42 = vadd.f32 %v276_v11, %v741_v41  ;;  %v211_v43 = vadd.f32 %v466_v12, %v786_v48 }
 0x101   :  { %v291_v15 = vadd.f32 %v490_v13, %v786_v48  ;;  %v205_v16 = vpop.f32.mrf.mxu0  ;;  %v285_v17 = vpop.f32.mrf.mxu1 }
 0x102   :  { %338 = vst [vmem:[%s951_s3 + $0x60] sm:$0xff] %v306_v14  ;;  %354 = vst [vmem:[%s951_s3 + $0xe0] sm:$0xff] %v322_v42  ;;  %v309_v18 = vadd.f32 %v211_v43, %v774_v46  ;;  %v206_v41 = vadd.f32 %v786_v48, %v205_v16  ;;  %v286_v19 = vadd.f32 %v786_v48, %v285_v17 }
 0x103   :  { %v325_v40 = vadd.f32 %v291_v15, %v779_v47 }
 0x104   :  { %341 = vst [vmem:[%s951_s3 + $0x78] sm:$0xff] %v309_v18  ;;  %v308_v20 = vadd.f32 %v206_v41, %v760_v44  ;;  %v324_v21 = vadd.f32 %v286_v19, %v765_v45 }
 0x105   :  { %357 = vst [vmem:[%s951_s3 + $0xf8] sm:$0xff] %v325_v40 }
 0x106   :  { %340 = vst [vmem:[%s951_s3 + $0x70] sm:$0xff] %v308_v20  ;;  %356 = vst [vmem:[%s951_s3 + $0xf0] sm:$0xff] %v324_v21 }

</bundles_post_ra>
